<compile_context>
chip_gen: v6e
topology: v6e:2x2x1
jax: 0.10.0
libtpu: 0.0.40
codegen_flags: <defaults>
</compile_context>

<pallas_src>
import functools

import jax
import jax.numpy as jnp
from jax.experimental import pallas as pl
from jax.experimental.pallas import tpu as pltpu


def _cdiv(a, b):
    return -(-a // b)


def _round_up(x, m):
    return _cdiv(x, m) * m


# ---------------------------------------------------------------------------
# Pallas kernel: fused (conv-as-matmul + bias + relu) -> (fc1 + bias + relu),
# two grids per row, lane-dense bf16 store (all 128 output lanes are used).
# ---------------------------------------------------------------------------
def grid_cnn_kernel(x_ref, w1_ref, b1_ref, w2_ref, b2_ref, o_ref):
    # layer 1: (tm,32) @ (32,128) -> (tm,128)   [block-diag fused-im2col conv]
    h = jnp.dot(x_ref[...], w1_ref[...], preferred_element_type=jnp.float32)
    h = jnp.maximum(h + b1_ref[...], 0.0)                 # f32 epilogue (v5e-safe)
    # layer 2: (tm,128) @ (128,128) -> (tm,128) [block-diag fc1]
    y = jnp.dot(h.astype(w2_ref.dtype), w2_ref[...],
                preferred_element_type=jnp.float32)
    y = jnp.maximum(y + b2_ref[...], 0.0)
    o_ref[...] = y.astype(o_ref.dtype)                    # bf16 writeback (1/2 bytes)


# ---------------------------------------------------------------------------
# Parameter init (deterministic, torch-default-style uniform bounds).
# ---------------------------------------------------------------------------
def init_params(key):
    k1, k2, k3, k4 = jax.random.split(key, 4)
    # conv1 = nn.Conv2d(1, 16, 3): weight (16,1,3,3), bias (16,)
    conv_bound = 1.0 / (1 * 3 * 3) ** 0.5
    w_conv = jax.random.uniform(k1, (16, 1, 3, 3), jnp.float32, -conv_bound, conv_bound)
    b_conv = jax.random.uniform(k2, (16,), jnp.float32, -conv_bound, conv_bound)
    # fc1 = nn.Linear(64, 64): weight (64_out, 64_in), bias (64,)
    fc_bound = 1.0 / 64 ** 0.5
    w_fc = jax.random.uniform(k3, (64, 64), jnp.float32, -fc_bound, fc_bound)
    b_fc = jax.random.uniform(k4, (64,), jnp.float32, -fc_bound, fc_bound)
    return dict(w_conv=w_conv, b_conv=b_conv, w_fc=w_fc, b_fc=b_fc)


def pack_kernel_weights(params):
    """Torch-layout weights -> pack-2 block-diagonal fused matmul operands."""
    w_conv, b_conv = params["w_conv"], params["b_conv"]
    w_fc, b_fc = params["w_fc"], params["b_fc"]

    # Fold im2col into the conv weight:  h[:, c*4 + p] = x_flat @ W_eff[:, c*4 + p]
    # where x_flat is the row-major flatten of the 4x4 grid and p = out_i*2 + out_j
    # (matches PyTorch's CHW flatten of the (16,2,2) conv output).
    wc3 = w_conv.reshape(16, 3, 3)
    w_eff = jnp.zeros((16, 64), jnp.float32)
    for p in range(4):
        i, j = divmod(p, 2)
        for di in range(3):
            for dj in range(3):
                m = (i + di) * 4 + (j + dj)
                w_eff = w_eff.at[m, p::4].set(wc3[:, di, dj])
    bc = jnp.tile(b_conv.reshape(16, 1), (1, 4)).reshape(1, 64)  # bc[0,c*4+p]=b[c]

    # Pack-2 block-diagonal operands (two independent grids share one row):
    #   row = [x_a(16) | x_b(16)]  ->  [h_a(64) | h_b(64)]  ->  [y_a(64) | y_b(64)]
    w1 = (jnp.zeros((32, 128), jnp.float32)
          .at[:16, :64].set(w_eff)
          .at[16:, 64:].set(w_eff))
    b1 = jnp.concatenate([bc, bc], axis=-1)                       # (1,128)

    wfT = w_fc.T                                                  # (in,out)
    w2 = (jnp.zeros((128, 128), jnp.float32)
          .at[:64, :64].set(wfT)
          .at[64:, 64:].set(wfT))
    b2 = jnp.concatenate([b_fc, b_fc]).reshape(1, 128)            # (1,128)

    # bf16 weights feed the MXU (f32 accumulation in-kernel); biases stay f32.
    return (w1.astype(jnp.bfloat16), b1, w2.astype(jnp.bfloat16), b2)


# ---------------------------------------------------------------------------
# Batched forward (featuresOfTasks): (B,4,4) -> (B,64) via one pallas_call.
# ---------------------------------------------------------------------------
@functools.partial(jax.jit, static_argnames=("tm_max",))
def grid_cnn_features(vs, w1, b1, w2, b2, *, tm_max=4096):
    """Applies the per-grid GridCNN.forward path to every grid in the batch.
    (The PyTorch 3-D batched path feeds the batch dim into conv channels and
    only works for B==1, so the intended per-grid semantics are implemented.)
    Returns bf16 features (B,64); kernel writeback is half the f32 bytes."""
    assert vs.ndim == 3 and vs.shape[1:] == (4, 4)
    B = vs.shape[0]
    x = jnp.asarray(vs, jnp.bfloat16).reshape(B, 16)   # direct bf16 cast, one pass

    # Two grids per logical row.
    R = _round_up(B, 2) // 2
    # Tile choice: >=2 parallel steps when there is enough work (v7x megacore),
    # tm always a multiple of 8 (Mosaic sublane rule), padding bounded by <8 rows
    # beyond ceil(R/steps) instead of up to tm-1.
    min_steps = 2 if R >= 16 else 1
    steps = max(min_steps, _cdiv(R, tm_max))
    tm = _round_up(_cdiv(R, steps), 8)
    r_pad = _round_up(R, tm)

    if 2 * r_pad != B:
        x = jnp.pad(x, ((0, 2 * r_pad - B), (0, 0)))
    x = x.reshape(r_pad, 32)        # contiguous: row r = [grid 2r | grid 2r+1]

    def const_spec(shape):          # constant block index => pinned in VMEM
        return pl.BlockSpec(shape, lambda i: (0, 0))

    flops = 2 * r_pad * (32 * 128 + 128 * 128)
    bytes_accessed = (r_pad * (32 + 128) * 2            # bf16 activations in/out
                      + (32 * 128 + 128 * 128) * 2      # bf16 weights
                      + 2 * 128 * 4 * 2)                # f32 biases

    y = pl.pallas_call(
        grid_cnn_kernel,
        out_shape=jax.ShapeDtypeStruct((r_pad, 128), jnp.bfloat16),
        grid_spec=pltpu.PrefetchScalarGridSpec(
            num_scalar_prefetch=0,
            grid=(r_pad // tm,),
            in_specs=[
                pl.BlockSpec((tm, 32), lambda i: (i, 0)),   # packed activations
                const_spec((32, 128)),                       # block-diag conv weight
                const_spec((1, 128)),                        # conv bias (tiled)
                const_spec((128, 128)),                      # block-diag fc weight
                const_spec((1, 128)),                        # fc bias (tiled)
            ],
            out_specs=pl.BlockSpec((tm, 128), lambda i: (i, 0)),
        ),
        compiler_params=pltpu.CompilerParams(
            dimension_semantics=("parallel",)),
        cost_estimate=pl.CostEstimate(
            flops=flops, transcendentals=0, bytes_accessed=bytes_accessed),
    )(x, w1, b1, w2, b2)

    # Un-pack: contiguous reshape (r_pad,128)->(2*r_pad,64) + contiguous row
    # slice (no strided column slice over the padded output anymore).
    return y.reshape(2 * r_pad, 64)[:B]


# ---------------------------------------------------------------------------
# Single-grid latency path (GridCNN.forward with a (4,4) input -> (64,)).
# At M=1 a pallas_call is pure overhead; let XLA fuse the tiny dots.
# ---------------------------------------------------------------------------
@jax.jit
def grid_cnn_forward_single(v, w1, b1, w2, b2):
    x = jnp.asarray(v, jnp.float32).reshape(1, 16)
    h = jax.nn.relu(x @ w1[:16, :64].astype(jnp.float32) + b1[:, :64])
    y = jax.nn.relu(h @ w2[:64, :64].astype(jnp.float32) + b2[:, :64])
    return y[0]


# ---------------------------------------------------------------------------
# Pure-JAX reference (real NCHW conv) for correctness checks.
# quantized=True emulates the kernel's bf16 weight/activation rounding.
# ---------------------------------------------------------------------------
def reference_features(vs, params, *, quantized=False):
    w_conv, b_conv = params["w_conv"], params["b_conv"]
    w_fc, b_fc = params["w_fc"], params["b_fc"]
    if quantized:
        w_conv = w_conv.astype(jnp.bfloat16).astype(jnp.float32)
        w_fc = w_fc.astype(jnp.bfloat16).astype(jnp.float32)
    x = vs.astype(jnp.float32)[:, None]                     # (B,1,4,4)
    conv = jax.lax.conv_general_dilated(
        x, w_conv, window_strides=(1, 1), padding="VALID",
        dimension_numbers=("NCHW", "OIHW", "NCHW"),
        precision=jax.lax.Precision.HIGHEST)
    h = jax.nn.relu(conv + b_conv.reshape(1, 16, 1, 1)).reshape(-1, 64)
    if quantized:
        h = h.astype(jnp.bfloat16).astype(jnp.float32)
    y = jax.nn.relu(
        jnp.dot(h, w_fc.T, precision=jax.lax.Precision.HIGHEST) + b_fc)
    if quantized:
        y = y.astype(jnp.bfloat16).astype(jnp.float32)
    return y


# TODO(synk): GridTask / GridState program-execution scoring (symbolic CPU
# interpreter logic) has no Pallas equivalent and is intentionally not ported.

if __name__ == "__main__":
    key = jax.random.PRNGKey(0)
    kp, kx = jax.random.split(key)

    params = init_params(kp)
    packed = pack_kernel_weights(params)

    # Small deterministic batch of 4x4 binary "goal grids" (featuresOfTasks
    # path).  tm_max=8 forces a multi-step batch grid plus row/pack padding so
    # the pinned-weight / tiled-activation pipeline and the pack-2 un-pack path
    # are exercised even at this tiny size; production uses tm_max=4096.
    B = 22
    vs = jax.random.bernoulli(kx, 0.4, (B, 4, 4)).astype(jnp.float32)

    feats = grid_cnn_features(vs, *packed, tm_max=8)
    feats = jax.block_until_ready(feats)
    assert feats.shape == (B, 64), feats.shape
    assert feats.dtype == jnp.bfloat16, feats.dtype
    feats_f32 = feats.astype(jnp.float32)

    # Tight check vs a reference that emulates the kernel's bf16 quantization.
    ref_q = reference_features(vs, params, quantized=True)
    assert jnp.allclose(feats_f32, ref_q, atol=1.5e-2, rtol=1.5e-2), \
        float(jnp.max(jnp.abs(feats_f32 - ref_q)))
    # Loose check vs the full-precision PyTorch-equivalent module (bf16 bound).
    ref_f = reference_features(vs, params, quantized=False)
    assert jnp.allclose(feats_f32, ref_f, atol=5e-2, rtol=5e-2), \
        float(jnp.max(jnp.abs(feats_f32 - ref_f)))

    # Odd / tiny batch with default tile sizing (single-step grid, pack padding).
    B2 = 5
    vs2 = jax.random.bernoulli(jax.random.PRNGKey(3), 0.4, (B2, 4, 4)).astype(jnp.float32)
    feats2 = jax.block_until_ready(grid_cnn_features(vs2, *packed))
    assert feats2.shape == (B2, 64) and feats2.dtype == jnp.bfloat16
    ref2 = reference_features(vs2, params, quantized=True)
    assert jnp.allclose(feats2.astype(jnp.float32), ref2, atol=1.5e-2, rtol=1.5e-2)

    # Single-grid (inserted_batch -> view(-1)) path, pure XLA per review.
    single = jax.block_until_ready(grid_cnn_forward_single(vs[0], *packed))
    assert single.shape == (64,) and single.dtype == jnp.float32
    assert jnp.allclose(single, ref_f[0], atol=5e-2, rtol=5e-2)

    print("KERNEL_OK")
</pallas_src>

<mosaic_0001>
module attributes {stable_mosaic.version = 11 : i64} {
  func.func @grid_cnn_kernel(%arg0: i32, %arg1: memref<8x32xbf16, #tpu.memory_space<vmem>>, %arg2: memref<32x128xbf16, #tpu.memory_space<vmem>>, %arg3: memref<1x128xf32, #tpu.memory_space<vmem>>, %arg4: memref<128x128xbf16, #tpu.memory_space<vmem>>, %arg5: memref<1x128xf32, #tpu.memory_space<vmem>>, %arg6: memref<8x128xbf16, #tpu.memory_space<vmem>>) attributes {dimension_semantics = [#tpu.dimension_semantics<parallel>], iteration_bounds = array<i64: 2>, scalar_prefetch = 0 : i64, scratch_operands = 0 : i64, tpu.core_type = #tpu.core_type<tc>, window_params = [{transform_indices = @transform_0, window_bounds = array<i64: 8, 32>}, {pipeline_mode = #tpu.pipeline_mode<synchronous>, transform_indices = @transform_1, window_bounds = array<i64: 32, 128>}, {pipeline_mode = #tpu.pipeline_mode<synchronous>, transform_indices = @transform_2, window_bounds = array<i64: 1, 128>}, {pipeline_mode = #tpu.pipeline_mode<synchronous>, transform_indices = @transform_3, window_bounds = array<i64: 128, 128>}, {pipeline_mode = #tpu.pipeline_mode<synchronous>, transform_indices = @transform_4, window_bounds = array<i64: 1, 128>}, {transform_indices = @transform_5, window_bounds = array<i64: 8, 128>}]} {
    %c0 = arith.constant 0 : index
    %c0_0 = arith.constant 0 : index
    %0 = vector.load %arg1[%c0, %c0_0] : memref<8x32xbf16, #tpu.memory_space<vmem>>, vector<8x32xbf16>
    %c0_1 = arith.constant 0 : index
    %c0_2 = arith.constant 0 : index
    %1 = vector.load %arg2[%c0_1, %c0_2] : memref<32x128xbf16, #tpu.memory_space<vmem>>, vector<32x128xbf16>
    %cst = arith.constant dense<0.000000e+00> : vector<8x128xf32>
    %2 = tpu.matmul %0, %1, %cst {dimension_numbers = #tpu.dot_dimension_numbers<[1], [0], [0], [1], [0, 0, 1, 1], [], []>} : vector<8x32xbf16>, vector<32x128xbf16>, vector<8x128xf32> -> vector<8x128xf32>
    %c0_3 = arith.constant 0 : index
    %c0_4 = arith.constant 0 : index
    %3 = vector.load %arg3[%c0_3, %c0_4] : memref<1x128xf32, #tpu.memory_space<vmem>>, vector<1x128xf32>
    %4 = vector.broadcast %3 : vector<1x128xf32> to vector<8x128xf32>
    %5 = arith.addf %2, %4 : vector<8x128xf32>
    %cst_5 = arith.constant 0.000000e+00 : f32
    %6 = vector.broadcast %cst_5 : f32 to vector<8x128xf32>
    %7 = arith.maximumf %5, %6 : vector<8x128xf32>
    %8 = arith.truncf %7 : vector<8x128xf32> to vector<8x128xbf16>
    %c0_6 = arith.constant 0 : index
    %c0_7 = arith.constant 0 : index
    %9 = vector.load %arg4[%c0_6, %c0_7] : memref<128x128xbf16, #tpu.memory_space<vmem>>, vector<128x128xbf16>
    %cst_8 = arith.constant dense<0.000000e+00> : vector<8x128xf32>
    %10 = tpu.matmul %8, %9, %cst_8 {dimension_numbers = #tpu.dot_dimension_numbers<[1], [0], [0], [1], [0, 0, 1, 1], [], []>} : vector<8x128xbf16>, vector<128x128xbf16>, vector<8x128xf32> -> vector<8x128xf32>
    %c0_9 = arith.constant 0 : index
    %c0_10 = arith.constant 0 : index
    %11 = vector.load %arg5[%c0_9, %c0_10] : memref<1x128xf32, #tpu.memory_space<vmem>>, vector<1x128xf32>
    %12 = vector.broadcast %11 : vector<1x128xf32> to vector<8x128xf32>
    %13 = arith.addf %10, %12 : vector<8x128xf32>
    %cst_11 = arith.constant 0.000000e+00 : f32
    %14 = vector.broadcast %cst_11 : f32 to vector<8x128xf32>
    %15 = arith.maximumf %13, %14 : vector<8x128xf32>
    %16 = arith.truncf %15 : vector<8x128xf32> to vector<8x128xbf16>
    %c0_12 = arith.constant 0 : index
    %c0_13 = arith.constant 0 : index
    %17 = vector.load %arg6[%c0_12, %c0_13] : memref<8x128xbf16, #tpu.memory_space<vmem>>, vector<8x128xbf16>
    tpu.vector_store %arg6[%c0_12, %c0_13], %16 {strides = array<i32>} : memref<8x128xbf16, #tpu.memory_space<vmem>>, vector<8x128xbf16>,
    return
  }
  func.func @transform_0(%arg0: i32) -> (i32, i32) {
    %c0_i32 = arith.constant 0 : i32
    %c0_i32_0 = arith.constant 0 : i32
    return %arg0, %c0_i32 : i32, i32
  }
  func.func @transform_1(%arg0: i32) -> (i32, i32) {
    %c0_i32 = arith.constant 0 : i32
    %c0_i32_0 = arith.constant 0 : i32
    %c0_i32_1 = arith.constant 0 : i32
    return %c0_i32, %c0_i32_0 : i32, i32
  }
  func.func @transform_2(%arg0: i32) -> (i32, i32) {
    %c0_i32 = arith.constant 0 : i32
    %c0_i32_0 = arith.constant 0 : i32
    %c0_i32_1 = arith.constant 0 : i32
    return %c0_i32, %c0_i32_0 : i32, i32
  }
  func.func @transform_3(%arg0: i32) -> (i32, i32) {
    %c0_i32 = arith.constant 0 : i32
    %c0_i32_0 = arith.constant 0 : i32
    %c0_i32_1 = arith.constant 0 : i32
    return %c0_i32, %c0_i32_0 : i32, i32
  }
  func.func @transform_4(%arg0: i32) -> (i32, i32) {
    %c0_i32 = arith.constant 0 : i32
    %c0_i32_0 = arith.constant 0 : i32
    %c0_i32_1 = arith.constant 0 : i32
    return %c0_i32, %c0_i32_0 : i32, i32
  }
  func.func @transform_5(%arg0: i32) -> (i32, i32) {
    %c0_i32 = arith.constant 0 : i32
    %c0_i32_0 = arith.constant 0 : i32
    return %arg0, %c0_i32 : i32, i32
  }
}

</mosaic_0001>

<bundles_post_ra>
// kernel: grid_cnn_features.1
= control target key start
LH: loop header
LB: loop body
LE: loop exit
PB: predicated region body
PF: predicated region fallthrough
CT: control target
= control target key end

     0   :  { %s580_s18 = smov 0   ;;  %s640_s0 = inlined_call_operand.vmem [shape: bf16[16,32], index: 0, kind: input, shape index: {}]   ;;  %s641_s1 = inlined_call_operand.vmem [shape: bf16[32,128], index: 1, kind: input, shape index: {}]   ;;  %s642_s2 = inlined_call_operand.vmem [shape: f32[1,128], index: 2, kind: input, shape index: {}]   ;;  %s643_s3 = inlined_call_operand.vmem [shape: bf16[128,128], index: 3, kind: input, shape index: {}]   ;;  %s644_s4 = inlined_call_operand.vmem [shape: f32[1,128], index: 4, kind: input, shape index: {}]   ;;  %s645_s5 = inlined_call_operand.vmem [shape: bf16[16,128], index: 5, kind: output, shape index: {}]  }
   0x1 LB: > { %s458_s19 = sadd.s32 4294967295, %s546_s18   ;;  %p462_p0 = scmp.ge.s32.totalorder %s546_s18, 1  ;;  %s546_s18 = sphi %s580_s18, %s15_s18  }
   0x2   : > { %p186_p1 = scmp.lt.s32.totalorder %s546_s18, 3 }
   0x4   : > { %p187_p2 = pnand %p462_p0, %p186_p1 }
   0x5   : > { %p212_p3 = scmp.lt.s32.totalorder (!%p187_p2), %s458_s19, 1 }
   0x6   : > { %190 = sbr.rel (%p187_p2) target bundleno = 419 (0x1a3), region = 40 }
   0xb   : > { %v530_v0 = vld [vmem:[%s641_s1 + $0x8] sm:$0xff]   ;;  %v548_v1 = vmov 0.0   ;;  %v531_v2 = vld [vmem:[%s641_s1] sm:$0xff]   ;;  %vm549_vm0 = vmmov 0   ;;  %v532_v3 = vld [vmem:[%s643_s3 + $0x38] sm:$0xff]   ;;  %s647_s19 = smov (!%p212_p3, %s458_s19), 1 }
   0xc   : > { %492 = vmatprep.subr.bf16.mxu0 %v548_v1  ;;  %500 = vmatprep.subr.bf16.mxu1 %v548_v1  ;;  %v533_v4 = vld [vmem:[%s643_s3 + $0x30] sm:$0xff]   ;;  %s463_s28 = sshll.u32 %s647_s19, 2  ;;  %vm245_vm1 = vcmask 261120   ;;  %v534_v6 = vld [vmem:[%s643_s3 + $0x28] sm:$0xff]   ;;  %v535_v7 = vld [vmem:[%s643_s3 + $0x20] sm:$0xff]  }
   0xd   : > { %493 = vmatpush3.bf16.msra.mxu0 %v530_v0  ;;  %496 = vmatprep.mubr.msk.bf16.mxu0 %vm549_vm0, %v548_v1  ;;  %s215_s6 = scalar_lea.vmem %s640_s0, %s463_s28  ;;  %v536_v8 = vld [vmem:[%s643_s3 + $0x18] sm:$0xff]   ;;  %v537_v9 = vld [vmem:[%s643_s3 + $0x10] sm:$0xff]   ;;  %v538_v10 = vld [vmem:[%s643_s3 + $0x8] sm:$0xff]   ;;  %s219_s27 = scalar_lea.vmem %s645_s5, %s463_s28 }
   0xe   : > { %494 = vmatprep.subr.bf16.mxu0 %v548_v1  ;;  %516 = vmatprep.mubr.msk.bf16.mxu1 %vm549_vm0, %v548_v1  ;;  %v221_v5 = vld [vmem:[%s215_s6] sm:$0xf] }
   0xf   : > { %501 = vmatpush3.bf16.msra.mxu1 %v532_v3  ;;  %v539_v11 = vld [vmem:[%s643_s3] sm:$0xff]  }
  0x10   : > { %502 = vmatprep.subr.bf16.mxu1 %v548_v1  ;;  %v465_v12 = vld [vmem:[%s642_s2] ss:$0 sm:$0xff] }
  0x11   : > { %495 = vmatpush3.bf16.msra.mxu0 %v531_v2  ;;  %v469_v20 = vld [vmem:[%s644_s4] ss:$0 sm:$0xff] }
  0x13   : > { %503 = vmatpush3.bf16.msra.mxu1 %v533_v4 }
  0x14   : > { %497 = vmatmul.mubr.msk.bf16.vlgmr.msra.gmra.mxu0 %vm245_vm1, %v221_v5  ;;  %504 = vmatprep.subr.bf16.mxu1 %v548_v1 }
  0x17   : > { %505 = vmatpush3.bf16.msra.mxu1 %v534_v6 }
  0x18   : > { %506 = vmatprep.subr.bf16.mxu1 %v548_v1 }
  0x1b   : > { %507 = vmatpush3.bf16.msra.mxu1 %v535_v7 }
  0x1c   : > { %508 = vmatprep.subr.bf16.mxu1 %v548_v1 }
  0x1f   : > { %509 = vmatpush3.bf16.msra.mxu1 %v536_v8 }
  0x20   : > { %510 = vmatprep.subr.bf16.mxu1 %v548_v1 }
  0x23   : > { %511 = vmatpush3.bf16.msra.mxu1 %v537_v9 }
  0x24   : > { %512 = vmatprep.subr.bf16.mxu1 %v548_v1 }
  0x27   : > { %513 = vmatpush3.bf16.msra.mxu1 %v538_v10 }
  0x28   : > { %514 = vmatprep.subr.bf16.mxu1 %v548_v1 }
  0x2b   : > { %515 = vmatpush3.bf16.msra.mxu1 %v539_v11 }
  0xd4   : > { %v283_v13 = vpop.f32.mrf.mxu0 }
  0xd5   : > { %v284_v14 = vadd.f32 %v465_v12, %v283_v13 }
  0xd6   : > { %v498_v15 = vpop.f32.mrf.mxu0 }
  0xd7   : > { %v289_v16 = vmax.f32 %v284_v14, 0.0 }
  0xd8   : > { %v286_v17 = vpop.f32.mrf.mxu0 }
  0xd9   : > { %v290_v18 = vpack.c.bf16 %v289_v16, %v289_v16 }
  0xda   : > { %v499_v19 = vpop.f32.mrf.mxu0 }
  0xdb   : > { %517 = vmatmul.mubr.bf16.vlgmr.msra.gmra.mxu1 %v290_v18 }
 0x19b   : > { %v396_v21 = vpop.f32.mrf.mxu1 }
 0x19c   : > { %v397_v22 = vadd.f32 %v469_v20, %v396_v21 }
 0x19d   : > { %v518_v23 = vpop.f32.mrf.mxu1 }
 0x19e   : > { %v402_v24 = vmax.f32 %v397_v22, 0.0 }
 0x19f   : > { %v399_v25 = vpop.f32.mrf.mxu1 }
 0x1a0   : > { %v403_v26 = vpack.c.bf16 %v402_v24, %v402_v24 }
 0x1a1   : > { %v519_v27 = vpop.f32.mrf.mxu1 }
 0x1a2   : > { %404 = vst [vmem:[%s219_s27] sm:$0xf] %v403_v26 }
 0x1a3 PF: > { %s15_s18 = sadd.s32 1, %s546_s18  }
 0x1a4   : > { %p12_p4 = scmp.ge.s32.totalorder %s15_s18, 4  }
 0x1a6   :  { %14 = sbr.rel (!%p12_p4) target bundleno = 1 (0x1), region = 70 }

</bundles_post_ra>
